<compile_context>
chip_gen: v7x
topology: tpu7x:2x2x1
jax: 0.10.0
libtpu: 0.0.40
codegen_flags: <defaults>
</compile_context>

<pallas_src>
import jax
import jax.numpy as jnp
from jax.experimental import pallas as pl
from jax.experimental.pallas import tpu as pltpu

_LANES = 128
_VMEM_LIMIT = 32 * 1024 * 1024          # explicit: v5e default scoped VMEM is 16 MiB
_SMALL_RAGGED_BYTES = 512 * 1024        # ragged tensors up to this run as one block
_MULTI_STEP_BYTES = 2 * 1024 * 1024     # above this, force an even grid of >= 4 steps


def _h_sigmoid_kernel(x_ref, o_ref):
    # relu6(x + 3) / 6 in the native dtype (weak-typed Python constants keep
    # the computation in x.dtype; mem-bound op, VPU/EUP work is negligible).
    x = x_ref[...]
    o_ref[...] = jnp.clip(x + 3.0, 0.0, 6.0) / 6.0


def _sublane_rows(itemsize: int) -> int:
    """Native packed-tile height: 8 rows for 32-bit, 16 for 16-bit, 32 for 8-bit."""
    return 8 * max(1, 4 // itemsize)


def _pick_tile_rows(rows: int, sub_rows: int, itemsize: int,
                    target_block_bytes: int) -> int:
    """Rows per block: ~target_block_bytes, a multiple of the packed-tile height,
    and (for > 2 MiB tensors) an even grid of >= 4 steps so both v7x
    TensorCores get >= 2 software-pipelined steps."""
    row_bytes = _LANES * itemsize
    units = pl.cdiv(rows, sub_rows)                      # packed-tile row groups
    target_units = max(1, target_block_bytes // (sub_rows * row_bytes))
    g = pl.cdiv(units, target_units)                     # steps needed at target size
    if rows * row_bytes > _MULTI_STEP_BYTES:
        g = max(g, 4)                                    # >= 2 pipelined steps per TC
    if g > 1 and g % 2:
        g += 1                                           # balanced split across 2 TCs
    g = min(g, units)
    tile_rows = pl.cdiv(units, g) * sub_rows
    return min(tile_rows, rows)                          # full-dim block when tiny


def _h_sigmoid_2d(x2d: jax.Array, tile_rows: int, n_elems: int) -> jax.Array:
    rows, lanes = x2d.shape
    itemsize = jnp.dtype(x2d.dtype).itemsize
    grid = (pl.cdiv(rows, tile_rows),)
    return pl.pallas_call(
        _h_sigmoid_kernel,
        out_shape=jax.ShapeDtypeStruct((rows, lanes), x2d.dtype),
        grid_spec=pltpu.PrefetchScalarGridSpec(
            num_scalar_prefetch=0,
            grid=grid,
            in_specs=[pl.BlockSpec((tile_rows, lanes), lambda i: (i, 0))],
            out_specs=pl.BlockSpec((tile_rows, lanes), lambda i: (i, 0)),
        ),
        compiler_params=pltpu.CompilerParams(
            dimension_semantics=("parallel",),
            vmem_limit_bytes=_VMEM_LIMIT,
        ),
        cost_estimate=pl.CostEstimate(
            flops=4 * n_elems,
            transcendentals=0,
            bytes_accessed=2 * n_elems * itemsize,
        ),
    )(x2d)


def h_sigmoid(x: jax.Array, *, target_block_bytes: int = 4 * 1024 * 1024) -> jax.Array:
    """Elementwise hard-sigmoid: relu6(x + 3) / 6 for float inputs of any shape."""
    if not jnp.issubdtype(x.dtype, jnp.floating):
        raise TypeError(f"h_sigmoid expects a floating dtype, got {x.dtype}")

    orig_shape = x.shape
    dtype = x.dtype
    n = x.size
    if n == 0:
        return x

    itemsize = jnp.dtype(dtype).itemsize
    sub_rows = _sublane_rows(itemsize)

    if n % _LANES == 0:
        # FAST PATH: free reshape to a lane-dense (rows, 128) slab, one pass.
        rows = n // _LANES
        tile_rows = _pick_tile_rows(rows, sub_rows, itemsize, target_block_bytes)
        out2d = _h_sigmoid_2d(x.reshape(rows, _LANES), tile_rows, n)
        return out2d.reshape(orig_shape)

    if n * itemsize <= _SMALL_RAGGED_BYTES:
        # Small ragged tensor (e.g. SE (N, C, 1, 1) vectors): one streaming pass,
        # whole array as a single full-shape block (always a legal block shape).
        out = pl.pallas_call(
            _h_sigmoid_kernel,
            out_shape=jax.ShapeDtypeStruct((n,), dtype),
            compiler_params=pltpu.CompilerParams(vmem_limit_bytes=_VMEM_LIMIT),
        )(x.reshape(-1))
        return out.reshape(orig_shape)

    # Large ragged tensor (rare for MobileNet activations): pad the tail to the
    # next lane multiple and reuse the tiled 2-D path.
    # TODO(synk): replace with a one-pass flat 1-D streaming path (tile a
    # multiple of 8*128*packing, Pallas-masked partial trailing block) to avoid
    # the extra pad + slice HBM copies on this rare path.
    rows = pl.cdiv(n, _LANES)
    pad = rows * _LANES - n
    x2d = jnp.pad(x.reshape(-1), (0, pad)).reshape(rows, _LANES)
    tile_rows = _pick_tile_rows(rows, sub_rows, itemsize, target_block_bytes)
    out2d = _h_sigmoid_2d(x2d, tile_rows, rows * _LANES)
    return out2d.reshape(-1)[:n].reshape(orig_shape)


if __name__ == "__main__":
    def ref(v):
        return jnp.clip(v.astype(jnp.float32) + 3.0, 0.0, 6.0) / 6.0

    # 1) NCHW activation, same convention as the PyTorch module (fast path).
    x = jax.random.normal(jax.random.PRNGKey(0), (2, 4, 16, 16), dtype=jnp.float32) * 4.0
    y = jax.block_until_ready(h_sigmoid(x))
    assert y.shape == x.shape and y.dtype == x.dtype
    assert jnp.max(jnp.abs(y - ref(x))) < 1e-6

    # 2) > 2 MiB activation — exercises the even, >= 4-step pipelined grid.
    x_big = jax.random.normal(jax.random.PRNGKey(2), (8, 8, 128, 128), dtype=jnp.float32) * 4.0
    y_big = jax.block_until_ready(h_sigmoid(x_big))
    assert y_big.shape == x_big.shape
    assert jnp.max(jnp.abs(y_big - ref(x_big))) < 1e-6

    # 3) Ragged size — one-pass single-block path (no pad / slice copies).
    x_rag = jax.random.normal(jax.random.PRNGKey(1), (3, 5, 7), dtype=jnp.float32) * 4.0
    y_rag = jax.block_until_ready(h_sigmoid(x_rag))
    assert y_rag.shape == x_rag.shape and y_rag.dtype == x_rag.dtype
    assert jnp.max(jnp.abs(y_rag - ref(x_rag))) < 1e-6

    # 4) bf16 path (native-dtype compute, 16-row packed-tile rounding).
    xb = x.astype(jnp.bfloat16)
    yb = jax.block_until_ready(h_sigmoid(xb))
    assert yb.shape == xb.shape and yb.dtype == jnp.bfloat16
    assert jnp.max(jnp.abs(yb.astype(jnp.float32) - ref(xb))) < 1e-2

    print("KERNEL_OK")
</pallas_src>

<mosaic_0001>
module attributes {stable_mosaic.version = 11 : i64} {
  func.func @_h_sigmoid_kernel(%arg0: i32, %arg1: memref<16x128xf32, #tpu.memory_space<vmem>>, %arg2: memref<16x128xf32, #tpu.memory_space<vmem>>) attributes {dimension_semantics = [#tpu.dimension_semantics<parallel>], iteration_bounds = array<i64: 1>, scalar_prefetch = 0 : i64, scratch_operands = 0 : i64, tpu.core_type = #tpu.core_type<tc>, window_params = [{transform_indices = @transform_0, window_bounds = array<i64: 16, 128>}, {transform_indices = @transform_1, window_bounds = array<i64: 16, 128>}]} {
    %c0 = arith.constant 0 : index
    %c0_0 = arith.constant 0 : index
    %0 = vector.load %arg1[%c0, %c0_0] : memref<16x128xf32, #tpu.memory_space<vmem>>, vector<16x128xf32>
    %cst = arith.constant 3.000000e+00 : f32
    %1 = vector.broadcast %cst : f32 to vector<16x128xf32>
    %2 = arith.addf %0, %1 : vector<16x128xf32>
    %cst_1 = arith.constant 0.000000e+00 : f32
    %cst_2 = arith.constant 6.000000e+00 : f32
    %3 = vector.broadcast %cst_1 : f32 to vector<16x128xf32>
    %4 = arith.maximumf %3, %2 : vector<16x128xf32>
    %5 = vector.broadcast %cst_2 : f32 to vector<16x128xf32>
    %6 = arith.minimumf %5, %4 : vector<16x128xf32>
    %cst_3 = arith.constant 6.000000e+00 : f32
    %7 = vector.broadcast %cst_3 : f32 to vector<16x128xf32>
    %8 = arith.divf %6, %7 : vector<16x128xf32>
    %c0_4 = arith.constant 0 : index
    %c0_5 = arith.constant 0 : index
    %9 = vector.load %arg2[%c0_4, %c0_5] : memref<16x128xf32, #tpu.memory_space<vmem>>, vector<16x128xf32>
    tpu.vector_store %arg2[%c0_4, %c0_5], %8 {strides = array<i32>} : memref<16x128xf32, #tpu.memory_space<vmem>>, vector<16x128xf32>,
    return
  }
  func.func @transform_0(%arg0: i32) -> (i32, i32) {
    %c0_i32 = arith.constant 0 : i32
    %c0_i32_0 = arith.constant 0 : i32
    return %arg0, %c0_i32 : i32, i32
  }
  func.func @transform_1(%arg0: i32) -> (i32, i32) {
    %c0_i32 = arith.constant 0 : i32
    %c0_i32_0 = arith.constant 0 : i32
    return %arg0, %c0_i32 : i32, i32
  }
}

</mosaic_0001>

<bundles_post_ra>
// kernel: tpu_custom_call.1
= control target key start
LH: loop header
LB: loop body
LE: loop exit
PB: predicated region body
PF: predicated region fallthrough
CT: control target
= control target key end

     0   :  { %6 = vsyncpa [#allocation3], 0  ;;  %s149_s0 = inlined_call_operand.hbm [shape: f32[16,128], index: 0, kind: input, shape index: {}]   ;;  %s150_s1 = inlined_call_operand.hbm [shape: f32[16,128], index: 1, kind: output, shape index: {}]  }
   0x1   :  { %7 = vsyncpa [#allocation4], 0  ;;  %s105_s6 = smov [#allocation2]   ;;  %s57_s10 = scalar_lea.hbm %s149_s0, 256 }
   0x2   :  { %s13_s7 = sshll.u32 %s105_s6, 4  ;;  %p58_p0 = scmp.ne.s32.totalorder %s149_s0, %s57_s10  ;;  %s14_s7 = int_to_ptr.vmem [resolvable:$true] %s13_s7 }
   0x3   :  { %p61_p1 = scmp.lt.u32.totalorder %s57_s10, %s149_s0 }
   0x5   :  { %p63_p2 = pnand %p61_p1, %p58_p0 }
   0x7   :  { %66 = shalt.err (!%p63_p2)
}
   0x8   :  { %s67_s15 = scalar_lea.vmem %s14_s7, 256  ;;  %p72_p4 = scmp.lt.s32.totalorder %s14_s7, %s14_s7 }
   0x9   :  { %p68_p3 = scmp.ne.s32.totalorder %s14_s7, %s67_s15  ;;  %p73_p5 = scmp.lt.s32.totalorder %s67_s15, %s67_s15 }
   0xb   :  { %p74_p6 = por %p73_p5, %p72_p4 }
   0xd   :  { %p75_p7 = pnand %p74_p6, %p68_p3 }
   0xf   :  { %78 = shalt.err (!%p75_p7)
}
  0x10   :  { %s106_s16 = smov 128   ;;  %s107_s17 = smov 8  }
  0x11   :  { %19 = dma.hbm_to_vmem [thread:$0]  %s149_s0, 256, %s14_s7, [#allocation3], %s106_s16, %s106_s16, %s107_s17  }
  0x12   :  { %101 = dma.done.wait [#allocation3], 256  }
  0x13   :  { %102 = vsyncadd [#allocation3], 4294967040  ;;  %v23_v0 = vld [vmem:[#allocation2] sm:$0xff]  ;;  %v24_v1 = vld [vmem:[#allocation2 + $0x8] sm:$0xff]  ;;  %s108_s20 = smov [#allocation5]  }
  0x14   :  { %v25_v2 = vadd.f32 3.0, %v23_v0  ;;  %v26_v3 = vadd.f32 3.0, %v24_v1  ;;  %s41_s21 = sshll.u32 %s108_s20, 4  ;;  %s42_s21 = int_to_ptr.vmem [resolvable:$true] %s41_s21 }
  0x15   :  { %s79_s22 = scalar_lea.vmem %s42_s21, 256  ;;  %p84_p9 = scmp.lt.s32.totalorder %s42_s21, %s42_s21 }
  0x16   :  { %v27_v4 = vmax.f32 %v25_v2, 0.0  ;;  %v28_v5 = vmax.f32 %v26_v3, 0.0  ;;  %p80_p8 = scmp.ne.s32.totalorder %s42_s21, %s79_s22  ;;  %p85_p10 = scmp.lt.s32.totalorder %s79_s22, %s79_s22 }
  0x18   :  { %v29_v6 = vmin.f32 %v27_v4, 6.0  ;;  %v30_v7 = vmin.f32 %v28_v5, 6.0  ;;  %p86_p11 = por %p85_p10, %p84_p9 }
  0x1a   :  { %v32_v8 = vmul.f32 0.16666667, %v29_v6  ;;  %v33_v9 = vmul.f32 0.16666667, %v30_v7  ;;  %p87_p12 = pnand %p86_p11, %p80_p8 }
  0x1c   :  { %34 = vst [vmem:[#allocation5] sm:$0xff] %v32_v8  ;;  %35 = vst [vmem:[#allocation5 + $0x8] sm:$0xff] %v33_v9 }
  0x1d   :  { %90 = shalt.err (!%p87_p12)
}
  0x1e   :  { %s91_s24 = scalar_lea.hbm %s150_s1, 256 }
  0x1f   :  { %p92_p13 = scmp.ne.s32.totalorder %s150_s1, %s91_s24  ;;  %p95_p0 = scmp.lt.u32.totalorder %s91_s24, %s150_s1 }
  0x21   :  { %p97_p1 = pnand %p95_p0, %p92_p13 }
  0x23   :  { %100 = shalt.err (!%p97_p1)
}
  0x24   :  { %47 = dma.vmem_to_hbm [thread:$0]  %s42_s21, 256, %s150_s1, [#allocation4], %s106_s16, %s106_s16, %s107_s17  }
  0x25   :  { %103 = dma.done.wait [#allocation4], 256  }
  0x26   :  { %104 = vsyncadd [#allocation4], 4294967040 }
  0x27   :  { %51 = vsyncpa [#allocation3], 1 }
  0x28   :  { %52 = vsyncpa [#allocation4], 1 }

</bundles_post_ra>
